<compile_context>
chip_gen: v5e
topology: v5e:2x2
jax: 0.10.0
libtpu: 0.0.40
codegen_flags: <defaults>
</compile_context>

<pallas_src>
import jax
import jax.numpy as jnp
from jax import lax
from jax.experimental import pallas as pl
from jax.experimental.pallas import tpu as pltpu

LEAKY_SLOPE = 0.01
BN_EPS = 1e-5


def _round_up(x, m):
    return (x + m - 1) // m * m


def _make_layer_kernel(n_valid, n_padded, with_residual):
    """Fused Linear -> LeakyReLU -> BatchNorm1d (train-mode batch stats).

    grid = (out-feature tiles ["parallel"], K-reduction tiles ["arbitrary"]).
    """

    def kernel(*refs):
        if with_residual:
            h_ref, wT_ref, b_ref, g_ref, be_ref, x_ref, out_ref, acc_ref = refs
        else:
            h_ref, wT_ref, b_ref, g_ref, be_ref, out_ref, acc_ref = refs
            x_ref = None

        k = pl.program_id(1)

        @pl.when(k == 0)
        def _():
            acc_ref[...] = jnp.zeros_like(acc_ref)

        # MXU: bf16 x bf16 tiles, f32 accumulation.
        acc_ref[...] += jnp.dot(h_ref[...], wT_ref[...],
                                preferred_element_type=jnp.float32)

        @pl.when(k == pl.num_programs(1) - 1)
        def _():
            y = acc_ref[...] + b_ref[...]            # Linear bias (f32)
            y = jnp.maximum(y, LEAKY_SLOPE * y)      # LeakyReLU

            # BatchNorm1d training-mode biased batch stats over rows (f32).
            inv_n = jnp.float32(1.0 / n_valid)
            if n_padded == n_valid:
                mean = jnp.sum(y, axis=0, keepdims=True) * inv_n
                diff = y - mean
                var = jnp.sum(diff * diff, axis=0, keepdims=True) * inv_n
            else:
                # Exclude zero-padded batch rows from the statistics.
                row = lax.broadcasted_iota(jnp.int32, (n_padded, 1), 0)
                mask = (row < n_valid).astype(jnp.float32)
                ym = y * mask
                mean = jnp.sum(ym, axis=0, keepdims=True) * inv_n
                diff = (y - mean) * mask
                var = jnp.sum(diff * diff, axis=0, keepdims=True) * inv_n

            # Fold BN into one per-feature affine: y * scale + shift.
            scale = g_ref[...] * lax.rsqrt(var + BN_EPS)
            shift = be_ref[...] - mean * scale
            out = y * scale + shift
            if with_residual:
                out = out + x_ref[...]               # residual (f32)
            out_ref[...] = out.astype(out_ref.dtype)

    return kernel


def _layer_call(h, wT, b, g, be, x_res, *, out_dtype, n_valid, tn, tk):
    Np, Dp = h.shape
    grid = (Dp // tn, Dp // tk)
    with_residual = x_res is not None

    in_specs = [
        pl.BlockSpec((Np, tk), lambda j, k: (0, k)),   # activations, K slice
        pl.BlockSpec((tk, tn), lambda j, k: (k, j)),   # weight tile (streamed)
        pl.BlockSpec((1, tn), lambda j, k: (0, j)),    # bias
        pl.BlockSpec((1, tn), lambda j, k: (0, j)),    # BN gamma
        pl.BlockSpec((1, tn), lambda j, k: (0, j)),    # BN beta
    ]
    args = [h, wT, b, g, be]
    if with_residual:
        in_specs.append(pl.BlockSpec((Np, tn), lambda j, k: (0, j)))
        args.append(x_res)

    # VMEM budget: double-buffered inputs/output + f32 accumulator, with headroom.
    est = 2 * (Np * tk * h.dtype.itemsize
               + tk * tn * wT.dtype.itemsize
               + 3 * tn * 4
               + Np * tn * jnp.dtype(out_dtype).itemsize
               + (Np * tn * 4 if with_residual else 0)) + Np * tn * 4
    vmem_limit = int(min(max(4 * est, 32 * 2**20), 60 * 2**20))

    kernel = _make_layer_kernel(n_valid, Np, with_residual)

    return pl.pallas_call(
        kernel,
        out_shape=jax.ShapeDtypeStruct((Np, Dp), out_dtype),
        grid_spec=pltpu.PrefetchScalarGridSpec(
            num_scalar_prefetch=0,
            grid=grid,
            in_specs=in_specs,
            out_specs=pl.BlockSpec((Np, tn), lambda j, k: (0, j)),
            scratch_shapes=[pltpu.VMEM((Np, tn), jnp.float32)],
        ),
        compiler_params=pltpu.CompilerParams(
            dimension_semantics=("parallel", "arbitrary"),
            vmem_limit_bytes=vmem_limit,
        ),
    )(*args)


def linskip_forward(x, params, *, tile_n=128, tile_k=128,
                    matmul_dtype=jnp.bfloat16):
    """x: (N, D). params: dict w{i}, b{i}, gamma{i}, beta{i} for i in 1..3."""
    N, D = x.shape
    Np = _round_up(max(N, 8), 8)
    Dp = _round_up(max(D, 128), 128)
    tn = min(tile_n, Dp)
    tk = min(tile_k, Dp)

    xf = x.astype(jnp.float32)
    x_pad = jnp.pad(xf, ((0, Np - N), (0, Dp - D)))      # f32 residual copy

    def prep(i):
        w = params[f"w{i}"].astype(jnp.float32)
        wT = jnp.pad(w.T, ((0, Dp - D), (0, Dp - D))).astype(matmul_dtype)
        b = jnp.pad(params[f"b{i}"].astype(jnp.float32), (0, Dp - D)).reshape(1, Dp)
        g = jnp.pad(params[f"gamma{i}"].astype(jnp.float32), (0, Dp - D)).reshape(1, Dp)
        be = jnp.pad(params[f"beta{i}"].astype(jnp.float32), (0, Dp - D)).reshape(1, Dp)
        return wT, b, g, be

    # Layers 1 & 2: keep intermediate activations in bf16 (halves DMA bytes);
    # all normalization math inside the kernel is f32.
    h = x_pad.astype(matmul_dtype)
    for i in (1, 2):
        wT, b, g, be = prep(i)
        h = _layer_call(h, wT, b, g, be, None, out_dtype=matmul_dtype,
                        n_valid=N, tn=tn, tk=tk)
    # Layer 3 with fused residual add, f32 output.
    wT, b, g, be = prep(3)
    out = _layer_call(h, wT, b, g, be, x_pad, out_dtype=jnp.float32,
                      n_valid=N, tn=tn, tk=tk)
    return out[:N, :D].astype(x.dtype)


def init_params(key, dim):
    """PyTorch-default-style init: Linear U(-1/sqrt(dim), 1/sqrt(dim)); BN gamma=1, beta=0."""
    bound = 1.0 / jnp.sqrt(dim)
    keys = jax.random.split(key, 6)
    params = {}
    for i in range(3):
        params[f"w{i+1}"] = jax.random.uniform(
            keys[2 * i], (dim, dim), jnp.float32, -bound, bound)
        params[f"b{i+1}"] = jax.random.uniform(
            keys[2 * i + 1], (dim,), jnp.float32, -bound, bound)
        params[f"gamma{i+1}"] = jnp.ones((dim,), jnp.float32)
        params[f"beta{i+1}"] = jnp.zeros((dim,), jnp.float32)
    return params


def linskip_reference(x, params, matmul_dtype=jnp.bfloat16):
    """Pure-JAX reference with the same matmul precision (bf16 operands, f32 accum)."""
    xf = x.astype(jnp.float32)
    h = xf
    for i in (1, 2, 3):
        hq = h.astype(matmul_dtype)
        wqT = params[f"w{i}"].astype(matmul_dtype).T
        y = jnp.dot(hq, wqT, preferred_element_type=jnp.float32) + params[f"b{i}"]
        y = jnp.maximum(y, LEAKY_SLOPE * y)
        mean = jnp.mean(y, axis=0, keepdims=True)
        var = jnp.mean((y - mean) ** 2, axis=0, keepdims=True)
        h = (y - mean) * lax.rsqrt(var + BN_EPS) * params[f"gamma{i}"] + params[f"beta{i}"]
    return h + xf


if __name__ == "__main__":
    key = jax.random.PRNGKey(0)
    k_x, k_p, k_x2, k_p2 = jax.random.split(key, 4)

    fwd = jax.jit(linskip_forward)

    # Small demo size (matches the module's toy usage); padded to (8, 128) internally.
    N, DIM = 8, 32
    x = jax.random.normal(k_x, (N, DIM), jnp.float32)
    params = init_params(k_p, DIM)
    out = jax.block_until_ready(fwd(x, params))
    ref = linskip_reference(x, params)
    assert out.shape == (N, DIM)
    assert jnp.allclose(out, ref, atol=2e-3, rtol=2e-3), "mismatch vs reference (small)"

    # Second check: unaligned sizes exercise batch-row masking and the
    # multi-tile (parallel feature axis, K-reduction axis) grid path.
    N2, DIM2 = 20, 320
    x2 = jax.random.normal(k_x2, (N2, DIM2), jnp.float32)
    params2 = init_params(k_p2, DIM2)
    out2 = jax.block_until_ready(fwd(x2, params2))
    ref2 = linskip_reference(x2, params2)
    assert jnp.allclose(out2, ref2, atol=2e-3, rtol=2e-3), "mismatch vs reference (tiled)"

    print("KERNEL_OK")
</pallas_src>

<mosaic_0001>
module attributes {stable_mosaic.version = 11 : i64} {
  func.func @kernel(%arg0: i32, %arg1: i32, %arg2: memref<8x128xbf16, #tpu.memory_space<vmem>>, %arg3: memref<128x128xbf16, #tpu.memory_space<vmem>>, %arg4: memref<1x128xf32, #tpu.memory_space<vmem>>, %arg5: memref<1x128xf32, #tpu.memory_space<vmem>>, %arg6: memref<1x128xf32, #tpu.memory_space<vmem>>, %arg7: memref<8x128xbf16, #tpu.memory_space<vmem>>, %arg8: memref<8x128xf32, #tpu.memory_space<vmem>>) attributes {dimension_semantics = [#tpu.dimension_semantics<parallel>, #tpu.dimension_semantics<arbitrary>], iteration_bounds = array<i64: 1, 1>, scalar_prefetch = 0 : i64, scratch_operands = 1 : i64, tpu.core_type = #tpu.core_type<tc>, window_params = [{transform_indices = @transform_0, window_bounds = array<i64: 8, 128>}, {transform_indices = @transform_1, window_bounds = array<i64: 128, 128>}, {transform_indices = @transform_2, window_bounds = array<i64: 1, 128>}, {transform_indices = @transform_3, window_bounds = array<i64: 1, 128>}, {transform_indices = @transform_4, window_bounds = array<i64: 1, 128>}, {transform_indices = @transform_5, window_bounds = array<i64: 8, 128>}]} {
    %c0_i32 = arith.constant 0 : i32
    %0 = arith.cmpi eq, %arg1, %c0_i32 : i32
    %1 = arith.extui %0 : i1 to i32
    %c0_i32_0 = arith.constant 0 : i32
    %2 = arith.cmpi ne, %1, %c0_i32_0 : i32
    scf.if %2 {
      %cst_10 = arith.constant 0.000000e+00 : f32
      %12 = vector.broadcast %cst_10 : f32 to vector<8x128xf32>
      %c0_11 = arith.constant 0 : index
      %c0_12 = arith.constant 0 : index
      %13 = vector.load %arg8[%c0_11, %c0_12] : memref<8x128xf32, #tpu.memory_space<vmem>>, vector<8x128xf32>
      tpu.vector_store %arg8[%c0_11, %c0_12], %12 {strides = array<i32>} : memref<8x128xf32, #tpu.memory_space<vmem>>, vector<8x128xf32>,
    } else {
    }
    %c0 = arith.constant 0 : index
    %c0_1 = arith.constant 0 : index
    %3 = vector.load %arg8[%c0, %c0_1] : memref<8x128xf32, #tpu.memory_space<vmem>>, vector<8x128xf32>
    %c0_2 = arith.constant 0 : index
    %c0_3 = arith.constant 0 : index
    %4 = vector.load %arg2[%c0_2, %c0_3] : memref<8x128xbf16, #tpu.memory_space<vmem>>, vector<8x128xbf16>
    %c0_4 = arith.constant 0 : index
    %c0_5 = arith.constant 0 : index
    %5 = vector.load %arg3[%c0_4, %c0_5] : memref<128x128xbf16, #tpu.memory_space<vmem>>, vector<128x128xbf16>
    %cst = arith.constant dense<0.000000e+00> : vector<8x128xf32>
    %6 = tpu.matmul %4, %5, %cst {dimension_numbers = #tpu.dot_dimension_numbers<[1], [0], [0], [1], [0, 0, 1, 1], [], []>} : vector<8x128xbf16>, vector<128x128xbf16>, vector<8x128xf32> -> vector<8x128xf32>
    %7 = arith.addf %3, %6 : vector<8x128xf32>
    %c0_6 = arith.constant 0 : index
    %c0_7 = arith.constant 0 : index
    %8 = vector.load %arg8[%c0_6, %c0_7] : memref<8x128xf32, #tpu.memory_space<vmem>>, vector<8x128xf32>
    tpu.vector_store %arg8[%c0_6, %c0_7], %7 {strides = array<i32>} : memref<8x128xf32, #tpu.memory_space<vmem>>, vector<8x128xf32>,
    %c0_i32_8 = arith.constant 0 : i32
    %9 = arith.cmpi eq, %arg1, %c0_i32_8 : i32
    %10 = arith.extui %9 : i1 to i32
    %c0_i32_9 = arith.constant 0 : i32
    %11 = arith.cmpi ne, %10, %c0_i32_9 : i32
    scf.if %11 {
      %c0_10 = arith.constant 0 : index
      %c0_11 = arith.constant 0 : index
      %12 = vector.load %arg8[%c0_10, %c0_11] : memref<8x128xf32, #tpu.memory_space<vmem>>, vector<8x128xf32>
      %c0_12 = arith.constant 0 : index
      %c0_13 = arith.constant 0 : index
      %13 = vector.load %arg4[%c0_12, %c0_13] : memref<1x128xf32, #tpu.memory_space<vmem>>, vector<1x128xf32>
      %14 = vector.broadcast %13 : vector<1x128xf32> to vector<8x128xf32>
      %15 = arith.addf %12, %14 : vector<8x128xf32>
      %cst_14 = arith.constant 0.00999999977 : f32
      %16 = vector.broadcast %cst_14 : f32 to vector<8x128xf32>
      %17 = arith.mulf %16, %15 : vector<8x128xf32>
      %18 = arith.maximumf %15, %17 : vector<8x128xf32>
      %cst_15 = arith.constant dense<0.000000e+00> : vector<128xf32>
      %19 = vector.multi_reduction <add>, %18, %cst_15 [0] : vector<8x128xf32> to vector<128xf32>
      %20 = vector.shape_cast %19 : vector<128xf32> to vector<1x128xf32>
      %cst_16 = arith.constant 1.250000e-01 : f32
      %21 = vector.broadcast %cst_16 : f32 to vector<1x128xf32>
      %22 = arith.mulf %20, %21 : vector<1x128xf32>
      %23 = vector.broadcast %22 : vector<1x128xf32> to vector<8x128xf32>
      %24 = arith.subf %18, %23 : vector<8x128xf32>
      %25 = arith.mulf %24, %24 : vector<8x128xf32>
      %cst_17 = arith.constant dense<0.000000e+00> : vector<128xf32>
      %26 = vector.multi_reduction <add>, %25, %cst_17 [0] : vector<8x128xf32> to vector<128xf32>
      %27 = vector.shape_cast %26 : vector<128xf32> to vector<1x128xf32>
      %cst_18 = arith.constant 1.250000e-01 : f32
      %28 = vector.broadcast %cst_18 : f32 to vector<1x128xf32>
      %29 = arith.mulf %27, %28 : vector<1x128xf32>
      %c0_19 = arith.constant 0 : index
      %c0_20 = arith.constant 0 : index
      %30 = vector.load %arg5[%c0_19, %c0_20] : memref<1x128xf32, #tpu.memory_space<vmem>>, vector<1x128xf32>
      %cst_21 = arith.constant 9.99999974E-6 : f32
      %31 = vector.broadcast %cst_21 : f32 to vector<1x128xf32>
      %32 = arith.addf %29, %31 : vector<1x128xf32>
      %33 = math.rsqrt %32 : vector<1x128xf32>
      %34 = arith.mulf %30, %33 : vector<1x128xf32>
      %c0_22 = arith.constant 0 : index
      %c0_23 = arith.constant 0 : index
      %35 = vector.load %arg6[%c0_22, %c0_23] : memref<1x128xf32, #tpu.memory_space<vmem>>, vector<1x128xf32>
      %36 = arith.mulf %22, %34 : vector<1x128xf32>
      %37 = arith.subf %35, %36 : vector<1x128xf32>
      %38 = vector.broadcast %34 : vector<1x128xf32> to vector<8x128xf32>
      %39 = arith.mulf %18, %38 : vector<8x128xf32>
      %40 = vector.broadcast %37 : vector<1x128xf32> to vector<8x128xf32>
      %41 = arith.addf %39, %40 : vector<8x128xf32>
      %42 = arith.truncf %41 : vector<8x128xf32> to vector<8x128xbf16>
      %c0_24 = arith.constant 0 : index
      %c0_25 = arith.constant 0 : index
      %43 = vector.load %arg7[%c0_24, %c0_25] : memref<8x128xbf16, #tpu.memory_space<vmem>>, vector<8x128xbf16>
      tpu.vector_store %arg7[%c0_24, %c0_25], %42 {strides = array<i32>} : memref<8x128xbf16, #tpu.memory_space<vmem>>, vector<8x128xbf16>,
    } else {
    }
    return
  }
  func.func @transform_0(%arg0: i32, %arg1: i32) -> (i32, i32) {
    %c0_i32 = arith.constant 0 : i32
    %c0_i32_0 = arith.constant 0 : i32
    return %c0_i32, %arg1 : i32, i32
  }
  func.func @transform_1(%arg0: i32, %arg1: i32) -> (i32, i32) {
    %c0_i32 = arith.constant 0 : i32
    return %arg1, %arg0 : i32, i32
  }
  func.func @transform_2(%arg0: i32, %arg1: i32) -> (i32, i32) {
    %c0_i32 = arith.constant 0 : i32
    %c0_i32_0 = arith.constant 0 : i32
    return %c0_i32, %arg0 : i32, i32
  }
  func.func @transform_3(%arg0: i32, %arg1: i32) -> (i32, i32) {
    %c0_i32 = arith.constant 0 : i32
    %c0_i32_0 = arith.constant 0 : i32
    return %c0_i32, %arg0 : i32, i32
  }
  func.func @transform_4(%arg0: i32, %arg1: i32) -> (i32, i32) {
    %c0_i32 = arith.constant 0 : i32
    %c0_i32_0 = arith.constant 0 : i32
    return %c0_i32, %arg0 : i32, i32
  }
  func.func @transform_5(%arg0: i32, %arg1: i32) -> (i32, i32) {
    %c0_i32 = arith.constant 0 : i32
    %c0_i32_0 = arith.constant 0 : i32
    return %c0_i32, %arg0 : i32, i32
  }
}

module attributes {stable_mosaic.version = 11 : i64} {
  func.func @kernel(%arg0: i32, %arg1: i32, %arg2: memref<8x128xbf16, #tpu.memory_space<vmem>>, %arg3: memref<128x128xbf16, #tpu.memory_space<vmem>>, %arg4: memref<1x128xf32, #tpu.memory_space<vmem>>, %arg5: memref<1x128xf32, #tpu.memory_space<vmem>>, %arg6: memref<1x128xf32, #tpu.memory_space<vmem>>, %arg7: memref<8x128xf32, #tpu.memory_space<vmem>>, %arg8: memref<8x128xf32, #tpu.memory_space<vmem>>, %arg9: memref<8x128xf32, #tpu.memory_space<vmem>>) attributes {dimension_semantics = [#tpu.dimension_semantics<parallel>, #tpu.dimension_semantics<arbitrary>], iteration_bounds = array<i64: 1, 1>, scalar_prefetch = 0 : i64, scratch_operands = 1 : i64, tpu.core_type = #tpu.core_type<tc>, window_params = [{transform_indices = @transform_0, window_bounds = array<i64: 8, 128>}, {transform_indices = @transform_1, window_bounds = array<i64: 128, 128>}, {transform_indices = @transform_2, window_bounds = array<i64: 1, 128>}, {transform_indices = @transform_3, window_bounds = array<i64: 1, 128>}, {transform_indices = @transform_4, window_bounds = array<i64: 1, 128>}, {transform_indices = @transform_5, window_bounds = array<i64: 8, 128>}, {transform_indices = @transform_6, window_bounds = array<i64: 8, 128>}]} {
    %c0_i32 = arith.constant 0 : i32
    %0 = arith.cmpi eq, %arg1, %c0_i32 : i32
    %1 = arith.extui %0 : i1 to i32
    %c0_i32_0 = arith.constant 0 : i32
    %2 = arith.cmpi ne, %1, %c0_i32_0 : i32
    scf.if %2 {
      %cst_10 = arith.constant 0.000000e+00 : f32
      %12 = vector.broadcast %cst_10 : f32 to vector<8x128xf32>
      %c0_11 = arith.constant 0 : index
      %c0_12 = arith.constant 0 : index
      %13 = vector.load %arg9[%c0_11, %c0_12] : memref<8x128xf32, #tpu.memory_space<vmem>>, vector<8x128xf32>
      tpu.vector_store %arg9[%c0_11, %c0_12], %12 {strides = array<i32>} : memref<8x128xf32, #tpu.memory_space<vmem>>, vector<8x128xf32>,
    } else {
    }
    %c0 = arith.constant 0 : index
    %c0_1 = arith.constant 0 : index
    %3 = vector.load %arg9[%c0, %c0_1] : memref<8x128xf32, #tpu.memory_space<vmem>>, vector<8x128xf32>
    %c0_2 = arith.constant 0 : index
    %c0_3 = arith.constant 0 : index
    %4 = vector.load %arg2[%c0_2, %c0_3] : memref<8x128xbf16, #tpu.memory_space<vmem>>, vector<8x128xbf16>
    %c0_4 = arith.constant 0 : index
    %c0_5 = arith.constant 0 : index
    %5 = vector.load %arg3[%c0_4, %c0_5] : memref<128x128xbf16, #tpu.memory_space<vmem>>, vector<128x128xbf16>
    %cst = arith.constant dense<0.000000e+00> : vector<8x128xf32>
    %6 = tpu.matmul %4, %5, %cst {dimension_numbers = #tpu.dot_dimension_numbers<[1], [0], [0], [1], [0, 0, 1, 1], [], []>} : vector<8x128xbf16>, vector<128x128xbf16>, vector<8x128xf32> -> vector<8x128xf32>
    %7 = arith.addf %3, %6 : vector<8x128xf32>
    %c0_6 = arith.constant 0 : index
    %c0_7 = arith.constant 0 : index
    %8 = vector.load %arg9[%c0_6, %c0_7] : memref<8x128xf32, #tpu.memory_space<vmem>>, vector<8x128xf32>
    tpu.vector_store %arg9[%c0_6, %c0_7], %7 {strides = array<i32>} : memref<8x128xf32, #tpu.memory_space<vmem>>, vector<8x128xf32>,
    %c0_i32_8 = arith.constant 0 : i32
    %9 = arith.cmpi eq, %arg1, %c0_i32_8 : i32
    %10 = arith.extui %9 : i1 to i32
    %c0_i32_9 = arith.constant 0 : i32
    %11 = arith.cmpi ne, %10, %c0_i32_9 : i32
    scf.if %11 {
      %c0_10 = arith.constant 0 : index
      %c0_11 = arith.constant 0 : index
      %12 = vector.load %arg9[%c0_10, %c0_11] : memref<8x128xf32, #tpu.memory_space<vmem>>, vector<8x128xf32>
      %c0_12 = arith.constant 0 : index
      %c0_13 = arith.constant 0 : index
      %13 = vector.load %arg4[%c0_12, %c0_13] : memref<1x128xf32, #tpu.memory_space<vmem>>, vector<1x128xf32>
      %14 = vector.broadcast %13 : vector<1x128xf32> to vector<8x128xf32>
      %15 = arith.addf %12, %14 : vector<8x128xf32>
      %cst_14 = arith.constant 0.00999999977 : f32
      %16 = vector.broadcast %cst_14 : f32 to vector<8x128xf32>
      %17 = arith.mulf %16, %15 : vector<8x128xf32>
      %18 = arith.maximumf %15, %17 : vector<8x128xf32>
      %cst_15 = arith.constant dense<0.000000e+00> : vector<128xf32>
      %19 = vector.multi_reduction <add>, %18, %cst_15 [0] : vector<8x128xf32> to vector<128xf32>
      %20 = vector.shape_cast %19 : vector<128xf32> to vector<1x128xf32>
      %cst_16 = arith.constant 1.250000e-01 : f32
      %21 = vector.broadcast %cst_16 : f32 to vector<1x128xf32>
      %22 = arith.mulf %20, %21 : vector<1x128xf32>
      %23 = vector.broadcast %22 : vector<1x128xf32> to vector<8x128xf32>
      %24 = arith.subf %18, %23 : vector<8x128xf32>
      %25 = arith.mulf %24, %24 : vector<8x128xf32>
      %cst_17 = arith.constant dense<0.000000e+00> : vector<128xf32>
      %26 = vector.multi_reduction <add>, %25, %cst_17 [0] : vector<8x128xf32> to vector<128xf32>
      %27 = vector.shape_cast %26 : vector<128xf32> to vector<1x128xf32>
      %cst_18 = arith.constant 1.250000e-01 : f32
      %28 = vector.broadcast %cst_18 : f32 to vector<1x128xf32>
      %29 = arith.mulf %27, %28 : vector<1x128xf32>
      %c0_19 = arith.constant 0 : index
      %c0_20 = arith.constant 0 : index
      %30 = vector.load %arg5[%c0_19, %c0_20] : memref<1x128xf32, #tpu.memory_space<vmem>>, vector<1x128xf32>
      %cst_21 = arith.constant 9.99999974E-6 : f32
      %31 = vector.broadcast %cst_21 : f32 to vector<1x128xf32>
      %32 = arith.addf %29, %31 : vector<1x128xf32>
      %33 = math.rsqrt %32 : vector<1x128xf32>
      %34 = arith.mulf %30, %33 : vector<1x128xf32>
      %c0_22 = arith.constant 0 : index
      %c0_23 = arith.constant 0 : index
      %35 = vector.load %arg6[%c0_22, %c0_23] : memref<1x128xf32, #tpu.memory_space<vmem>>, vector<1x128xf32>
      %36 = arith.mulf %22, %34 : vector<1x128xf32>
      %37 = arith.subf %35, %36 : vector<1x128xf32>
      %38 = vector.broadcast %34 : vector<1x128xf32> to vector<8x128xf32>
      %39 = arith.mulf %18, %38 : vector<8x128xf32>
      %40 = vector.broadcast %37 : vector<1x128xf32> to vector<8x128xf32>
      %41 = arith.addf %39, %40 : vector<8x128xf32>
      %c0_24 = arith.constant 0 : index
      %c0_25 = arith.constant 0 : index
      %42 = vector.load %arg7[%c0_24, %c0_25] : memref<8x128xf32, #tpu.memory_space<vmem>>, vector<8x128xf32>
      %43 = arith.addf %41, %42 : vector<8x128xf32>
      %c0_26 = arith.constant 0 : index
      %c0_27 = arith.constant 0 : index
      %44 = vector.load %arg8[%c0_26, %c0_27] : memref<8x128xf32, #tpu.memory_space<vmem>>, vector<8x128xf32>
      tpu.vector_store %arg8[%c0_26, %c0_27], %43 {strides = array<i32>} : memref<8x128xf32, #tpu.memory_space<vmem>>, vector<8x128xf32>,
    } else {
    }
    return
  }
  func.func @transform_0(%arg0: i32, %arg1: i32) -> (i32, i32) {
    %c0_i32 = arith.constant 0 : i32
    %c0_i32_0 = arith.constant 0 : i32
    return %c0_i32, %arg1 : i32, i32
  }
  func.func @transform_1(%arg0: i32, %arg1: i32) -> (i32, i32) {
    %c0_i32 = arith.constant 0 : i32
    return %arg1, %arg0 : i32, i32
  }
  func.func @transform_2(%arg0: i32, %arg1: i32) -> (i32, i32) {
    %c0_i32 = arith.constant 0 : i32
    %c0_i32_0 = arith.constant 0 : i32
    return %c0_i32, %arg0 : i32, i32
  }
  func.func @transform_3(%arg0: i32, %arg1: i32) -> (i32, i32) {
    %c0_i32 = arith.constant 0 : i32
    %c0_i32_0 = arith.constant 0 : i32
    return %c0_i32, %arg0 : i32, i32
  }
  func.func @transform_4(%arg0: i32, %arg1: i32) -> (i32, i32) {
    %c0_i32 = arith.constant 0 : i32
    %c0_i32_0 = arith.constant 0 : i32
    return %c0_i32, %arg0 : i32, i32
  }
  func.func @transform_5(%arg0: i32, %arg1: i32) -> (i32, i32) {
    %c0_i32 = arith.constant 0 : i32
    %c0_i32_0 = arith.constant 0 : i32
    return %c0_i32, %arg0 : i32, i32
  }
  func.func @transform_6(%arg0: i32, %arg1: i32) -> (i32, i32) {
    %c0_i32 = arith.constant 0 : i32
    %c0_i32_0 = arith.constant 0 : i32
    return %c0_i32, %arg0 : i32, i32
  }
}

</mosaic_0001>

<bundles_post_ra>
// kernel: linskip_forward.5
= control target key start
LH: loop header
LB: loop body
LE: loop exit
PB: predicated region body
PF: predicated region fallthrough
CT: control target
= control target key end

     0   :  { %s328_s0 = inlined_call_operand.vmem [shape: bf16[8,128], index: 0, kind: input, shape index: {}]   ;;  %s329_s1 = inlined_call_operand.vmem [shape: bf16[128,128], index: 1, kind: input, shape index: {}]   ;;  %s330_s2 = inlined_call_operand.vmem [shape: f32[1,128], index: 2, kind: input, shape index: {}]   ;;  %s331_s3 = inlined_call_operand.vmem [shape: f32[1,128], index: 3, kind: input, shape index: {}]   ;;  %s332_s4 = inlined_call_operand.vmem [shape: f32[1,128], index: 4, kind: input, shape index: {}]   ;;  %s333_s5 = inlined_call_operand.vmem [shape: f32[8,128], index: 5, kind: input, shape index: {}]   ;;  %s334_s6 = inlined_call_operand.hbm [shape: f32[8,128], index: 6, kind: output, shape index: {}]  }
   0x1   :  { %v219_v0 = vld [vmem:[%s329_s1 + $0x38] sm:$0xff]  ;;  %v218_v1 = vld [vmem:[%s329_s1 + $0x30] sm:$0xff] }
   0x2   :  { %95 = vmatpush.bf16.msra.mxu0 %v219_v0 }
   0x3   :  { %11 = vsyncpa [#allocation4], 0  ;;  %v217_v2 = vld [vmem:[%s329_s1 + $0x28] sm:$0xff]  ;;  %v216_v3 = vld [vmem:[%s329_s1 + $0x20] sm:$0xff]  ;;  %s250_s20 = smov [#allocation3]   ;;  %s171_s23 = sshll.u32 %s334_s6, 4  ;;  %s172_s23 = int_to_ptr.hbm [resolvable:$true] %s171_s23 }
   0x4   :  { %v215_v4 = vld [vmem:[%s329_s1 + $0x18] sm:$0xff]  ;;  %v214_v5 = vld [vmem:[%s329_s1 + $0x10] sm:$0xff]  ;;  %v213_v6 = vld [vmem:[%s329_s1 + $0x8] sm:$0xff] }
   0x5   :  { %v212_v7 = vld [vmem:[%s329_s1] sm:$0xff] }
   0x6   :  { %96 = vmatpush.bf16.msra.mxu0 %v218_v1  ;;  %v30_v8 = vld [vmem:[%s328_s0] sm:$0xf] }
   0x7   :  { %v221_v9 = vld [vmem:[%s330_s2] ss:$0 sm:$0xff] }
   0x8   :  { %v137_v37 = vld [vmem:[%s331_s3] sm:$0x1]  ;;  %s169_s3 = sshll.u32 %s250_s20, 4  ;;  %s170_s3 = int_to_ptr.vmem [resolvable:$true] %s169_s3 }
   0x9   :  { %v150_v41 = vld [vmem:[%s332_s4] sm:$0x1] }
   0xa   :  { %97 = vmatpush.bf16.msra.mxu0 %v217_v2  ;;  %v161_v47 = vld [vmem:[%s333_s5] sm:$0xff] }
   0xe   :  { %98 = vmatpush.bf16.msra.mxu0 %v216_v3 }
  0x12   :  { %99 = vmatpush.bf16.msra.mxu0 %v215_v4 }
  0x16   :  { %100 = vmatpush.bf16.msra.mxu0 %v214_v5 }
  0x1a   :  { %101 = vmatpush.bf16.msra.mxu0 %v213_v6 }
  0x1e   :  { %102 = vmatpush.bf16.msra.mxu0 %v212_v7 }
  0x21   :  { %103 = vmatmul.bf16.vlgmr.msra.gmra.mxu0 %v30_v8 }
  0x9e   :  { %v104_v10 = vpop.f32.mrf.mxu0 }
  0x9f   :  { %v118_v11 = vadd.f32 %v221_v9, %v104_v10 }
  0xa1   :  { %v119_v12 = vmul.f32 0.01, %v118_v11 }
  0xa3   :  { %v120_v13 = vmax.f32 %v118_v11, %v119_v12 }
  0xa5   :  { %v121_v14 = vrot.slane %v120_v13, 4 }
  0xa6   :  { %v106_v15 = vpop.f32.mrf.mxu0 }
  0xa7   :  { %v122_v16 = vadd.f32 %v121_v14, %v120_v13 }
  0xa9   :  { %v123_v17 = vrot.slane %v122_v16, 2 }
  0xab   :  { %v124_v18 = vadd.f32 %v123_v17, %v122_v16 }
  0xad   :  { %v125_v19 = vrot.slane %v124_v18, 1 }
  0xaf   :  { %v126_v20 = vadd.f32 %v125_v19, %v124_v18 }
  0xb1   :  { %v127_v21 = vmul.f32 0.125, %v126_v20 }
  0xb3   :  { %v128_v22 = vsub.f32 %v120_v13, %v127_v21 }
  0xb5   :  { %v129_v23 = vmul.f32 %v128_v22, %v128_v22 }
  0xb7   :  { %v130_v24 = vrot.slane %v129_v23, 4 }
  0xb9   :  { %v131_v25 = vadd.f32 %v130_v24, %v129_v23 }
  0xbb   :  { %v132_v26 = vrot.slane %v131_v25, 2 }
  0xbd   :  { %v133_v27 = vadd.f32 %v132_v26, %v131_v25 }
  0xbf   :  { %v134_v28 = vrot.slane %v133_v27, 1 }
  0xc1   :  { %v135_v29 = vadd.f32 %v134_v28, %v133_v27 }
  0xc3   :  { %v136_v30 = vmul.f32 0.125, %v135_v29 }
  0xc5   :  { %v138_v31 = vadd.f32 1e-05, %v136_v30 }
  0xc7   :  { %222 = vrsqrt.f32 %v138_v31  ;;  %vm145_vm1 = vweird.f32 %v138_v31 }
  0xcd   :  { %v223_v32 = vpop.eup %222 }
  0xce   :  { %v140_v33 = vmul.f32 %v223_v32, %v138_v31  ;;  %vm146_vm0 = vweird.f32 %v223_v32 }
  0xcf   :  { %vm147_vm2 = vmor %vm145_vm1, %vm146_vm0 }
  0xd0   :  { %v141_v34 = vmul.f32 %v223_v32, %v140_v33 }
  0xd2   :  { %v142_v35 = vmul.f32 0.5, %v141_v34 }
  0xd4   :  { %v143_v36 = vsub.f32 1.5, %v142_v35 }
  0xd6   :  { %v144_v38 = vmul.f32 %v223_v32, %v143_v36 }
  0xd8   :  { %v148_v39 = vsel %vm147_vm2, %v223_v32, %v144_v38 }
  0xd9   :  { %v149_v40 = vmul.f32 %v148_v39, %v137_v37 }
  0xdb   :  { %v151_v42 = vmul.f32 %v149_v40, %v127_v21  ;;  %v154_v43 = vperm.slane %v149_v40, 0 }
  0xdd   :  { %v152_v44 = vsub.f32 %v150_v41, %v151_v42  ;;  %v156_v45 = vmul.f32 %v154_v43, %v120_v13 }
  0xdf   :  { %v158_v46 = vperm.slane %v152_v44, 0 }
  0xe1   :  { %v160_v48 = vadd.f32 %v158_v46, %v156_v45 }
  0xe3   :  { %v162_v49 = vadd.f32 %v161_v47, %v160_v48 }
  0xe5   :  { %163 = vst [vmem:[#allocation3] sm:$0xff] %v162_v49 }
  0xe6   :  { %174 = dma.vmem_to_hbm [thread:$0]  %s170_s3, 128, %s172_s23, [#allocation4]  }
  0xe7   :  { %248 = dma.done.wait [#allocation4], 128  }
  0xe8   :  { %249 = vsyncadd [#allocation4], 4294967168 }
  0xe9   :  { %179 = vsyncpa [#allocation4], 1 }

// kernel: linskip_forward.3
= control target key start
LH: loop header
LB: loop body
LE: loop exit
PB: predicated region body
PF: predicated region fallthrough
CT: control target
= control target key end

     0   :  { %s275_s1 = inlined_call_operand.vmem [shape: bf16[128,128], index: 1, kind: input, shape index: {}]   ;;  %s276_s2 = inlined_call_operand.vmem [shape: f32[1,128], index: 2, kind: input, shape index: {}]   ;;  %s277_s0 = inlined_call_operand.vmem [shape: bf16[8,128], index: 0, kind: input, shape index: {}]   ;;  %s278_s3 = inlined_call_operand.vmem [shape: f32[1,128], index: 3, kind: input, shape index: {}]   ;;  %s279_s4 = inlined_call_operand.vmem [shape: f32[1,128], index: 4, kind: input, shape index: {}]   ;;  %s280_s5 = inlined_call_operand.vmem [shape: bf16[8,128], index: 5, kind: output, shape index: {}]  }
   0x1   :  { %v202_v0 = vld [vmem:[%s275_s1 + $0x38] sm:$0xff]  ;;  %v201_v1 = vld [vmem:[%s275_s1 + $0x30] sm:$0xff]  ;;  %v200_v2 = vld [vmem:[%s275_s1 + $0x28] sm:$0xff] }
   0x2   :  { %91 = vmatpush.bf16.msra.mxu0 %v202_v0  ;;  %v199_v3 = vld [vmem:[%s275_s1 + $0x20] sm:$0xff]  ;;  %v198_v4 = vld [vmem:[%s275_s1 + $0x18] sm:$0xff]  ;;  %v197_v5 = vld [vmem:[%s275_s1 + $0x10] sm:$0xff] }
   0x3   :  { %v196_v6 = vld [vmem:[%s275_s1 + $0x8] sm:$0xff]  ;;  %v195_v7 = vld [vmem:[%s275_s1] sm:$0xff] }
   0x4   :  { %v26_v8 = vld [vmem:[%s277_s0] sm:$0xf] }
   0x5   :  { %v203_v9 = vld [vmem:[%s276_s2] ss:$0 sm:$0xff] }
   0x6   :  { %92 = vmatpush.bf16.msra.mxu0 %v201_v1  ;;  %v133_v37 = vld [vmem:[%s278_s3] sm:$0x1] }
   0x7   :  { %v146_v41 = vld [vmem:[%s279_s4] sm:$0x1] }
   0xa   :  { %93 = vmatpush.bf16.msra.mxu0 %v200_v2 }
   0xe   :  { %94 = vmatpush.bf16.msra.mxu0 %v199_v3 }
  0x12   :  { %95 = vmatpush.bf16.msra.mxu0 %v198_v4 }
  0x16   :  { %96 = vmatpush.bf16.msra.mxu0 %v197_v5 }
  0x1a   :  { %97 = vmatpush.bf16.msra.mxu0 %v196_v6 }
  0x1e   :  { %98 = vmatpush.bf16.msra.mxu0 %v195_v7 }
  0x21   :  { %99 = vmatmul.bf16.vlgmr.msra.gmra.mxu0 %v26_v8 }
  0x9e   :  { %v100_v10 = vpop.f32.mrf.mxu0 }
  0x9f   :  { %v114_v11 = vadd.f32 %v203_v9, %v100_v10 }
  0xa1   :  { %v115_v12 = vmul.f32 0.01, %v114_v11 }
  0xa3   :  { %v116_v13 = vmax.f32 %v114_v11, %v115_v12 }
  0xa5   :  { %v117_v14 = vrot.slane %v116_v13, 4 }
  0xa6   :  { %v102_v15 = vpop.f32.mrf.mxu0 }
  0xa7   :  { %v118_v16 = vadd.f32 %v117_v14, %v116_v13 }
  0xa9   :  { %v119_v17 = vrot.slane %v118_v16, 2 }
  0xab   :  { %v120_v18 = vadd.f32 %v119_v17, %v118_v16 }
  0xad   :  { %v121_v19 = vrot.slane %v120_v18, 1 }
  0xaf   :  { %v122_v20 = vadd.f32 %v121_v19, %v120_v18 }
  0xb1   :  { %v123_v21 = vmul.f32 0.125, %v122_v20 }
  0xb3   :  { %v124_v22 = vsub.f32 %v116_v13, %v123_v21 }
  0xb5   :  { %v125_v23 = vmul.f32 %v124_v22, %v124_v22 }
  0xb7   :  { %v126_v24 = vrot.slane %v125_v23, 4 }
  0xb9   :  { %v127_v25 = vadd.f32 %v126_v24, %v125_v23 }
  0xbb   :  { %v128_v26 = vrot.slane %v127_v25, 2 }
  0xbd   :  { %v129_v27 = vadd.f32 %v128_v26, %v127_v25 }
  0xbf   :  { %v130_v28 = vrot.slane %v129_v27, 1 }
  0xc1   :  { %v131_v29 = vadd.f32 %v130_v28, %v129_v27 }
  0xc3   :  { %v132_v30 = vmul.f32 0.125, %v131_v29 }
  0xc5   :  { %v134_v31 = vadd.f32 1e-05, %v132_v30 }
  0xc7   :  { %204 = vrsqrt.f32 %v134_v31  ;;  %vm141_vm1 = vweird.f32 %v134_v31 }
  0xcd   :  { %v205_v32 = vpop.eup %204 }
  0xce   :  { %v136_v33 = vmul.f32 %v205_v32, %v134_v31  ;;  %vm142_vm0 = vweird.f32 %v205_v32 }
  0xcf   :  { %vm143_vm2 = vmor %vm141_vm1, %vm142_vm0 }
  0xd0   :  { %v137_v34 = vmul.f32 %v205_v32, %v136_v33 }
  0xd2   :  { %v138_v35 = vmul.f32 0.5, %v137_v34 }
  0xd4   :  { %v139_v36 = vsub.f32 1.5, %v138_v35 }
  0xd6   :  { %v140_v38 = vmul.f32 %v205_v32, %v139_v36 }
  0xd8   :  { %v144_v39 = vsel %vm143_vm2, %v205_v32, %v140_v38 }
  0xd9   :  { %v145_v40 = vmul.f32 %v144_v39, %v133_v37 }
  0xdb   :  { %v147_v42 = vmul.f32 %v145_v40, %v123_v21  ;;  %v150_v43 = vperm.slane %v145_v40, 0 }
  0xdd   :  { %v148_v44 = vsub.f32 %v146_v41, %v147_v42  ;;  %v152_v45 = vmul.f32 %v150_v43, %v116_v13 }
  0xdf   :  { %v154_v46 = vperm.slane %v148_v44, 0 }
  0xe1   :  { %v156_v47 = vadd.f32 %v154_v46, %v152_v45 }
  0xe3   :  { %v157_v48 = vpack.c.bf16 %v156_v47, %v156_v47 }
  0xe5   :  { %158 = vst [vmem:[%s280_s5] sm:$0xf] %v157_v48 }

</bundles_post_ra>
